<compile_context>
chip_gen: v7x
topology: tpu7x:2x2x1
jax: 0.10.0
libtpu: 0.0.40
codegen_flags: <defaults>
</compile_context>

<pallas_src>
import functools
import math

import jax
import jax.numpy as jnp
from jax.experimental import pallas as pl
from jax.experimental.pallas import tpu as pltpu


def _round_up(x: int, m: int) -> int:
    return (x + m - 1) // m * m


def _embed_block_kernel(tok_ref, tab_ref, out_ref, *, scale, block_tokens, group):
    """One grid step: gather `block_tokens` table rows into a dense (T, E) tile.

    tok_ref : SMEM scalar-prefetch ref, (n_pad,) int32 token ids (flat).
    tab_ref : (V, E) VMEM block, grid-invariant (whole embedding table).
    out_ref : (T, E) VMEM output tile (sublane/lane dense).
    """
    base = pl.program_id(0) * block_tokens
    n_groups = block_tokens // group

    def copy_group(g, carry):
        start = pl.multiple_of(g * group, group)
        rows = []
        for r in range(group):                    # static unroll over one group
            idx = tok_ref[base + start + r]       # scalar id read from SMEM
            row = tab_ref[pl.ds(idx, 1), :]       # (1, E) dynamic row from VMEM
            rows.append(row.astype(jnp.float32) * scale)
        tile = jnp.concatenate(rows, axis=0)      # (group, E) sublane-dense tile
        out_ref[pl.ds(start, group), :] = tile.astype(out_ref.dtype)
        return carry

    jax.lax.fori_loop(0, n_groups, copy_group, 0)


def token_embedding(
    tokens: jax.Array, emb_table: jax.Array, *, block_tokens: int = 256
) -> jax.Array:
    """tokens: (...) integer ids.  emb_table: (V, E).  Returns (..., E)."""
    V, E = emb_table.shape
    itemsize = jnp.dtype(emb_table.dtype).itemsize
    scale = math.sqrt(E)  # matches `self.scale = math.sqrt(emb_size)`

    table_bytes = V * E * itemsize
    if table_bytes > 24 * 1024 * 1024:
        # TODO(synk): large-vocab path — keep the table in HBM (memory_space=pl.ANY)
        # and batch per-row pltpu.make_async_copy gathers into a double-buffered
        # VMEM scratch instead of keeping the whole table resident in VMEM.
        raise NotImplementedError(
            "embedding table too large to keep resident in VMEM"
        )

    lead_shape = tokens.shape
    n_tok = math.prod(lead_shape) if lead_shape else 1
    flat = tokens.reshape(n_tok).astype(jnp.int32)

    # Sublane-dense token group: 8 rows for fp32, 16 for bf16, 32 for int8.
    sublane = max(8, 32 // itemsize)
    T = min(_round_up(block_tokens, sublane), _round_up(n_tok, sublane))
    n_pad = _round_up(n_tok, T)
    if n_pad != n_tok:
        flat = jnp.pad(flat, (0, n_pad - n_tok))  # pad with id 0 (valid row)
    grid = (n_pad // T,)

    # Explicit VMEM budget: resident table (conservatively double-buffered by the
    # pipeliner) + double-buffered (T, E) output tile + slack.
    vmem_needed = 2 * table_bytes + 2 * T * E * itemsize + (1 << 20)
    vmem_limit = int(min(max(vmem_needed, 16 * 1024 * 1024), 64 * 1024 * 1024))

    out_flat = pl.pallas_call(
        functools.partial(
            _embed_block_kernel, scale=scale, block_tokens=T, group=sublane
        ),
        out_shape=jax.ShapeDtypeStruct((n_pad, E), emb_table.dtype),
        grid_spec=pltpu.PrefetchScalarGridSpec(
            num_scalar_prefetch=1,                    # token ids land in SMEM
            grid=grid,
            in_specs=[
                # Whole table, grid-invariant block -> fetched from HBM once.
                pl.BlockSpec((V, E), lambda i, toks: (0, 0)),
            ],
            # Dense (T, E) output tile -> one large unmasked writeback per step.
            out_specs=pl.BlockSpec((T, E), lambda i, toks: (i, 0)),
        ),
        compiler_params=pltpu.CompilerParams(
            dimension_semantics=("parallel",),        # token blocks independent
            vmem_limit_bytes=vmem_limit,
        ),
    )(flat, emb_table)

    return out_flat[:n_tok].reshape(*lead_shape, E)


if __name__ == "__main__":
    vocab_size = 32
    emb_size = 128            # multiple of 128 -> lane-aligned embedding rows
    batch, seq = 2, 8

    key = jax.random.PRNGKey(0)
    k_emb, k_tok = jax.random.split(key)

    # nn.Embedding default init ~ N(0, 1); deterministic synthetic weights.
    emb_table = jax.random.normal(k_emb, (vocab_size, emb_size), jnp.float32)
    tokens = jax.random.randint(k_tok, (batch, seq), 0, vocab_size, jnp.int32)

    scale = math.sqrt(emb_size)

    # Case 1: basic shapes from the module spec.
    out = token_embedding(tokens, emb_table)
    jax.block_until_ready(out)
    ref = jnp.take(emb_table, tokens, axis=0) * scale
    assert out.shape == (batch, seq, emb_size), out.shape
    assert jnp.allclose(out, ref, atol=1e-5, rtol=1e-5), "mismatch (case 1)"

    # Case 2: ragged token count (exercises padding up to the sublane multiple).
    tokens2 = jax.random.randint(
        jax.random.PRNGKey(1), (3, 5), 0, vocab_size, jnp.int32
    )
    out2 = token_embedding(tokens2, emb_table)
    jax.block_until_ready(out2)
    ref2 = jnp.take(emb_table, tokens2, axis=0) * scale
    assert out2.shape == (3, 5, emb_size), out2.shape
    assert jnp.allclose(out2, ref2, atol=1e-5, rtol=1e-5), "mismatch (case 2)"

    # Case 3: multiple token blocks per call (exercises the grid / base offsets).
    tokens3 = jax.random.randint(
        jax.random.PRNGKey(2), (4, 16), 0, vocab_size, jnp.int32
    )
    out3 = token_embedding(tokens3, emb_table, block_tokens=16)
    jax.block_until_ready(out3)
    ref3 = jnp.take(emb_table, tokens3, axis=0) * scale
    assert out3.shape == (4, 16, emb_size), out3.shape
    assert jnp.allclose(out3, ref3, atol=1e-5, rtol=1e-5), "mismatch (case 3)"

    print("KERNEL_OK")
</pallas_src>

<mosaic_0001>
module attributes {stable_mosaic.version = 11 : i64} {
  func.func @_embed_block_kernel(%arg0: i32, %arg1: memref<16xi32, #tpu.memory_space<smem>>, %arg2: memref<32x128xf32, #tpu.memory_space<vmem>>, %arg3: memref<16x128xf32, #tpu.memory_space<vmem>>) attributes {dimension_semantics = [#tpu.dimension_semantics<parallel>], iteration_bounds = array<i64: 1>, scalar_prefetch = 1 : i64, scratch_operands = 0 : i64, tpu.core_type = #tpu.core_type<tc>, window_params = [{pipeline_mode = #tpu.pipeline_mode<synchronous>, transform_indices = @transform_0, window_bounds = array<i64: 32, 128>}, {transform_indices = @transform_1, window_bounds = array<i64: 16, 128>}]} {
    %c16_i32 = arith.constant 16 : i32
    %0 = arith.muli %arg0, %c16_i32 : i32
    %c0_i32 = arith.constant 0 : i32
    %c2_i32 = arith.constant 2 : i32
    %1 = arith.addi %c0_i32, %c2_i32 : i32
    %c1_i32 = arith.constant 1 : i32
    scf.for %arg4 = %c0_i32 to %1 step %c1_i32  : i32 {
      %c8_i32 = arith.constant 8 : i32
      %2 = arith.muli %arg4, %c8_i32 : i32
      %3 = tpu.assume_multiple %2, 8 : i32
      %4 = arith.addi %0, %3 : i32
      %c0_i32_1 = arith.constant 0 : i32
      %5 = arith.addi %4, %c0_i32_1 : i32
      %6 = arith.index_cast %5 : i32 to index
      %7 = memref.load %arg1[%6] : memref<16xi32, #tpu.memory_space<smem>>
      %8 = arith.index_cast %7 : i32 to index
      %c0 = arith.constant 0 : index
      %9 = vector.load %arg2[%8, %c0] : memref<32x128xf32, #tpu.memory_space<vmem>>, vector<1x128xf32>
      %cst = arith.constant 11.3137083 : f32
      %10 = vector.broadcast %cst : f32 to vector<1x128xf32>
      %11 = arith.mulf %9, %10 : vector<1x128xf32>
      %12 = arith.addi %0, %3 : i32
      %c1_i32_2 = arith.constant 1 : i32
      %13 = arith.addi %12, %c1_i32_2 : i32
      %14 = arith.index_cast %13 : i32 to index
      %15 = memref.load %arg1[%14] : memref<16xi32, #tpu.memory_space<smem>>
      %16 = arith.index_cast %15 : i32 to index
      %c0_3 = arith.constant 0 : index
      %17 = vector.load %arg2[%16, %c0_3] : memref<32x128xf32, #tpu.memory_space<vmem>>, vector<1x128xf32>
      %cst_4 = arith.constant 11.3137083 : f32
      %18 = vector.broadcast %cst_4 : f32 to vector<1x128xf32>
      %19 = arith.mulf %17, %18 : vector<1x128xf32>
      %20 = arith.addi %0, %3 : i32
      %c2_i32_5 = arith.constant 2 : i32
      %21 = arith.addi %20, %c2_i32_5 : i32
      %22 = arith.index_cast %21 : i32 to index
      %23 = memref.load %arg1[%22] : memref<16xi32, #tpu.memory_space<smem>>
      %24 = arith.index_cast %23 : i32 to index
      %c0_6 = arith.constant 0 : index
      %25 = vector.load %arg2[%24, %c0_6] : memref<32x128xf32, #tpu.memory_space<vmem>>, vector<1x128xf32>
      %cst_7 = arith.constant 11.3137083 : f32
      %26 = vector.broadcast %cst_7 : f32 to vector<1x128xf32>
      %27 = arith.mulf %25, %26 : vector<1x128xf32>
      %28 = arith.addi %0, %3 : i32
      %c3_i32 = arith.constant 3 : i32
      %29 = arith.addi %28, %c3_i32 : i32
      %30 = arith.index_cast %29 : i32 to index
      %31 = memref.load %arg1[%30] : memref<16xi32, #tpu.memory_space<smem>>
      %32 = arith.index_cast %31 : i32 to index
      %c0_8 = arith.constant 0 : index
      %33 = vector.load %arg2[%32, %c0_8] : memref<32x128xf32, #tpu.memory_space<vmem>>, vector<1x128xf32>
      %cst_9 = arith.constant 11.3137083 : f32
      %34 = vector.broadcast %cst_9 : f32 to vector<1x128xf32>
      %35 = arith.mulf %33, %34 : vector<1x128xf32>
      %36 = arith.addi %0, %3 : i32
      %c4_i32 = arith.constant 4 : i32
      %37 = arith.addi %36, %c4_i32 : i32
      %38 = arith.index_cast %37 : i32 to index
      %39 = memref.load %arg1[%38] : memref<16xi32, #tpu.memory_space<smem>>
      %40 = arith.index_cast %39 : i32 to index
      %c0_10 = arith.constant 0 : index
      %41 = vector.load %arg2[%40, %c0_10] : memref<32x128xf32, #tpu.memory_space<vmem>>, vector<1x128xf32>
      %cst_11 = arith.constant 11.3137083 : f32
      %42 = vector.broadcast %cst_11 : f32 to vector<1x128xf32>
      %43 = arith.mulf %41, %42 : vector<1x128xf32>
      %44 = arith.addi %0, %3 : i32
      %c5_i32 = arith.constant 5 : i32
      %45 = arith.addi %44, %c5_i32 : i32
      %46 = arith.index_cast %45 : i32 to index
      %47 = memref.load %arg1[%46] : memref<16xi32, #tpu.memory_space<smem>>
      %48 = arith.index_cast %47 : i32 to index
      %c0_12 = arith.constant 0 : index
      %49 = vector.load %arg2[%48, %c0_12] : memref<32x128xf32, #tpu.memory_space<vmem>>, vector<1x128xf32>
      %cst_13 = arith.constant 11.3137083 : f32
      %50 = vector.broadcast %cst_13 : f32 to vector<1x128xf32>
      %51 = arith.mulf %49, %50 : vector<1x128xf32>
      %52 = arith.addi %0, %3 : i32
      %c6_i32 = arith.constant 6 : i32
      %53 = arith.addi %52, %c6_i32 : i32
      %54 = arith.index_cast %53 : i32 to index
      %55 = memref.load %arg1[%54] : memref<16xi32, #tpu.memory_space<smem>>
      %56 = arith.index_cast %55 : i32 to index
      %c0_14 = arith.constant 0 : index
      %57 = vector.load %arg2[%56, %c0_14] : memref<32x128xf32, #tpu.memory_space<vmem>>, vector<1x128xf32>
      %cst_15 = arith.constant 11.3137083 : f32
      %58 = vector.broadcast %cst_15 : f32 to vector<1x128xf32>
      %59 = arith.mulf %57, %58 : vector<1x128xf32>
      %60 = arith.addi %0, %3 : i32
      %c7_i32 = arith.constant 7 : i32
      %61 = arith.addi %60, %c7_i32 : i32
      %62 = arith.index_cast %61 : i32 to index
      %63 = memref.load %arg1[%62] : memref<16xi32, #tpu.memory_space<smem>>
      %64 = arith.index_cast %63 : i32 to index
      %c0_16 = arith.constant 0 : index
      %65 = vector.load %arg2[%64, %c0_16] : memref<32x128xf32, #tpu.memory_space<vmem>>, vector<1x128xf32>
      %cst_17 = arith.constant 11.3137083 : f32
      %66 = vector.broadcast %cst_17 : f32 to vector<1x128xf32>
      %67 = arith.mulf %65, %66 : vector<1x128xf32>
      %68 = tpu.concatenate %11, %19, %27, %35, %43, %51, %59, %67 in 0 : vector<1x128xf32>, vector<1x128xf32>, vector<1x128xf32>, vector<1x128xf32>, vector<1x128xf32>, vector<1x128xf32>, vector<1x128xf32>, vector<1x128xf32> -> vector<8x128xf32>
      %69 = arith.index_cast %3 : i32 to index
      %c0_18 = arith.constant 0 : index
      %70 = vector.load %arg3[%69, %c0_18] : memref<16x128xf32, #tpu.memory_space<vmem>>, vector<8x128xf32>
      tpu.vector_store %arg3[%69, %c0_18], %68 {strides = array<i32>} : memref<16x128xf32, #tpu.memory_space<vmem>>, vector<8x128xf32>,
    }
    %c2_i32_0 = arith.constant 2 : i32
    return
  }
  func.func @transform_0(%arg0: i32, %arg1: memref<16xi32, #tpu.memory_space<smem>>) -> (i32, i32) {
    %c0_i32 = arith.constant 0 : i32
    %c0_i32_0 = arith.constant 0 : i32
    %c0_i32_1 = arith.constant 0 : i32
    return %c0_i32, %c0_i32_0 : i32, i32
  }
  func.func @transform_1(%arg0: i32, %arg1: memref<16xi32, #tpu.memory_space<smem>>) -> (i32, i32) {
    %c0_i32 = arith.constant 0 : i32
    %c0_i32_0 = arith.constant 0 : i32
    return %arg0, %c0_i32 : i32, i32
  }
}

</mosaic_0001>

<bundles_post_ra>
// kernel: tpu_custom_call.1
= control target key start
LH: loop header
LB: loop body
LE: loop exit
PB: predicated region body
PF: predicated region fallthrough
CT: control target
= control target key end

     0   :  { %s312_s0 = inlined_call_operand.hbm [shape: s32[16], index: 0, kind: input, shape index: {}]   ;;  %s313_s1 = inlined_call_operand.hbm [shape: f32[32,128], index: 1, kind: input, shape index: {}]   ;;  %s314_s2 = inlined_call_operand.hbm [shape: f32[16,128], index: 2, kind: output, shape index: {}]  }
   0x1   :  { %s159_s11 = scalar_lea.hbm %s312_s0, 16 }
   0x2   :  { %p160_p0 = scmp.ne.s32.totalorder %s312_s0, %s159_s11  ;;  %p163_p1 = scmp.lt.u32.totalorder %s159_s11, %s312_s0 }
   0x4   :  { %p165_p2 = pnand %p163_p1, %p160_p0 }
   0x6   :  { %168 = shalt.err (!%p165_p2)  }
   0x7   :  { %s227_s16 = smov [#allocation3]  }
   0x8   :  { %8 = dma.hbm_to_smem %s312_s0, 16, %s227_s16, [#allocation2] }
   0x9   :  { %217 = dma.done.wait [#allocation2], 16 }
   0xa   :  { %218 = vsyncadd [#allocation2], 4294967280 }
   0xb   :  { %10 = sfence }
   0xc   :  { %11 = vsyncpa [#allocation5], 0 }
   0xd   :  { %12 = vsyncpa [#allocation6], 0  ;;  %s228_s19 = smov [#allocation4]   ;;  %s169_s23 = scalar_lea.hbm %s313_s1, 512 }
   0xe   :  { %s18_s20 = sshll.u32 %s228_s19, 4  ;;  %p170_p3 = scmp.ne.s32.totalorder %s313_s1, %s169_s23  ;;  %s19_s20 = int_to_ptr.vmem [resolvable:$true] %s18_s20 }
   0xf   :  { %p173_p4 = scmp.lt.u32.totalorder %s169_s23, %s313_s1 }
  0x11   :  { %p175_p5 = pnand %p173_p4, %p170_p3 }
  0x13   :  { %178 = shalt.err (!%p175_p5)
}
  0x14   :  { %s179_s0 = scalar_lea.vmem %s19_s20, 512  ;;  %p184_p7 = scmp.lt.s32.totalorder %s19_s20, %s19_s20 }
  0x15   :  { %p180_p6 = scmp.ne.s32.totalorder %s19_s20, %s179_s0  ;;  %p185_p8 = scmp.lt.s32.totalorder %s179_s0, %s179_s0 }
  0x17   :  { %p186_p9 = por %p185_p8, %p184_p7 }
  0x19   :  { %p187_p10 = pnand %p186_p9, %p180_p6 }
  0x1b   :  { %190 = shalt.err (!%p187_p10)
}
  0x1c   :  { %s229_s28 = smov 128   ;;  %s230_s29 = smov 8  }
  0x1d   :  { %24 = dma.hbm_to_vmem [thread:$0]  %s313_s1, 512, %s19_s20, [#allocation5], %s229_s28, %s229_s28, %s230_s29  }
  0x1e   :  { %219 = dma.done.wait [#allocation5], 512  }
  0x1f   :  { %220 = vsyncadd [#allocation5], 4294966784  ;;  %s274_s4 = smov 0  }
  0x20 LB: > { %s280_s5 = sshll.u32 %s225_s4, 3  ;;  %vm97_vm0 = vcmask 1040384   ;;  %vm99_vm1 = vcmask 1041408   ;;  %vm101_vm2 = vcmask 1042432   ;;  %vm103_vm3 = vcmask 1043456   ;;  %s34_s4 = sadd.s32 1, %s225_s4   ;;  %s225_s4 = sphi %s274_s4, %s34_s4  }
  0x21   : > { %s37_s1 = sld [smem:[#allocation3 + %s280_s5]]  ;;  %s41_s6 = sadd.s32 1, %s280_s5  ;;  %vm105_vm4 = vcmask 1044480   ;;  %vm107_vm5 = vcmask 1045504   ;;  %vm109_vm6 = vcmask 1046528  }
  0x22   : > { %s42_s7 = sld [smem:[#allocation3 + %s41_s6]]  ;;  %s46_s8 = sadd.s32 2, %s280_s5 }
  0x23   : > { %s47_s9 = sld [smem:[#allocation3 + %s46_s8]]  ;;  %s51_s10 = sadd.s32 3, %s280_s5 }
  0x24   : > { %s52_s11 = sld [smem:[#allocation3 + %s51_s10]]  ;;  %s56_s12 = sadd.s32 4, %s280_s5 }
  0x25   : > { %s57_s13 = sld [smem:[#allocation3 + %s56_s12]]  ;;  %s61_s14 = sadd.s32 5, %s280_s5 }
  0x26   : > { %s62_s15 = sld [smem:[#allocation3 + %s61_s14]]  ;;  %s66_s16 = sadd.s32 6, %s280_s5 }
  0x27   : > { %s67_s17 = sld [smem:[#allocation3 + %s66_s16]]  ;;  %s38_s18 = scalar_lea.vmem [#allocation4], %s37_s1 }
  0x28   : > { %v39_v0 = vld [vmem:[%s38_s18] sm:$0x1]  ;;  %s71_s19 = sadd.s32 7, %s280_s5  ;;  %s43_s20 = scalar_lea.vmem [#allocation4], %s42_s7 }
  0x29   : > { %v40_v1 = vmul.f32 11.313708, %v39_v0  ;;  %v44_v2 = vld [vmem:[%s43_s20] sm:$0x1]  ;;  %s72_s21 = sld [smem:[#allocation3 + %s71_s19]]  ;;  %s48_s22 = scalar_lea.vmem [#allocation4], %s47_s9 }
  0x2a   : > { %v45_v3 = vmul.f32 11.313708, %v44_v2  ;;  %v49_v4 = vld [vmem:[%s48_s22] sm:$0x1]  ;;  %s53_s23 = scalar_lea.vmem [#allocation4], %s52_s11  ;;  %s111_s0 = scalar_lea.vmem [#allocation7], %s280_s5 }
  0x2b   : > { %v50_v5 = vmul.f32 11.313708, %v49_v4  ;;  %v54_v6 = vld [vmem:[%s53_s23] sm:$0x1]  ;;  %s58_s24 = scalar_lea.vmem [#allocation4], %s57_s13  ;;  %p31_p11 = scmp.ge.s32.totalorder %s34_s4, 2  }
  0x2c   : > { %v55_v7 = vmul.f32 11.313708, %v54_v6  ;;  %v59_v8 = vld [vmem:[%s58_s24] sm:$0x1]  ;;  %v77_v9 = vrot.slane %v45_v3, 7  ;;  %s63_s25 = scalar_lea.vmem [#allocation4], %s62_s15 }
  0x2d   : > { %v60_v10 = vmul.f32 11.313708, %v59_v8  ;;  %v64_v11 = vld [vmem:[%s63_s25] sm:$0x1]  ;;  %v80_v12 = vrot.slane %v50_v5, 6  ;;  %s68_s26 = scalar_lea.vmem [#allocation4], %s67_s17 }
  0x2e   : > { %v65_v13 = vmul.f32 11.313708, %v64_v11  ;;  %v69_v14 = vld [vmem:[%s68_s26] sm:$0x1]  ;;  %v83_v15 = vrot.slane %v55_v7, 5  ;;  %v98_v16 = vsel %vm97_vm0, %v40_v1, %v77_v9  ;;  %s231_s30 = smov (%p31_p11), [#allocation7]  }
  0x2f   : > { %v70_v17 = vmul.f32 11.313708, %v69_v14  ;;  %v86_v18 = vrot.slane %v60_v10, 4  ;;  %v100_v19 = vsel %vm99_vm1, %v98_v16, %v80_v12  ;;  %s73_s27 = scalar_lea.vmem [#allocation4], %s72_s21  ;;  %s118_s3 = sshll.u32 (%p31_p11), %s231_s30, 4  ;;  %s119_s3 = int_to_ptr.vmem [resolvable:$true] %s118_s3 }
  0x30   : > { %v74_v20 = vld [vmem:[%s73_s27] sm:$0x1]  ;;  %v89_v21 = vrot.slane %v65_v13, 3  ;;  %v102_v22 = vsel %vm101_vm2, %v100_v19, %v83_v15  ;;  %33 = sbr.rel (!%p31_p11) target bundleno = 32 (0x20), region = 44  ;;  %s191_s1 = scalar_lea.vmem (%p31_p11), %s119_s3, 256 }
  0x31   : > { %v75_v23 = vmul.f32 11.313708, %v74_v20  ;;  %v92_v24 = vrot.slane %v70_v17, 2  ;;  %v104_v25 = vsel %vm103_vm3, %v102_v22, %v86_v18  ;;  %p192_p12 = scmp.ne.s32.totalorder (%p31_p11), %s119_s3, %s191_s1  ;;  %p196_p13 = scmp.lt.s32.totalorder (%p31_p11), %s119_s3, %s119_s3 }
  0x32   : > { %v106_v26 = vsel %vm105_vm4, %v104_v25, %v89_v21  ;;  %p197_p0 = scmp.lt.s32.totalorder (%p31_p11), %s191_s1, %s191_s1 }
  0x33   : > { %v95_v27 = vrot.slane %v75_v23, 1  ;;  %v108_v28 = vsel %vm107_vm5, %v106_v26, %v92_v24 }
  0x34   :  { %p198_p1 = por (%p31_p11), %p197_p0, %p196_p13 }
  0x35   : > { %v110_v29 = vsel %vm109_vm6, %v108_v28, %v95_v27 }
  0x36   : > { %112 = vst [vmem:[%s111_s0] sm:$0xff] %v110_v29  ;;  %p199_p2 = pnand (%p31_p11), %p198_p1, %p192_p12 }
  0x38   :  { %202 = shalt.err (!%p199_p2)
}
  0x39   :  { %s203_s5 = scalar_lea.hbm %s314_s2, 256 }
  0x3a   :  { %p204_p3 = scmp.ne.s32.totalorder %s314_s2, %s203_s5  ;;  %p207_p4 = scmp.lt.u32.totalorder %s203_s5, %s314_s2 }
  0x3c   :  { %p209_p5 = pnand %p207_p4, %p204_p3 }
  0x3e   :  { %212 = shalt.err (!%p209_p5)
}
  0x3f   :  { %124 = dma.vmem_to_hbm [thread:$0]  %s119_s3, 256, %s314_s2, [#allocation6], %s229_s28, %s229_s28, %s230_s29  }
  0x40   :  { %221 = dma.done.wait [#allocation6], 256  }
  0x41   :  { %222 = vsyncadd [#allocation6], 4294967040 }
  0x42   :  { %128 = vsyncpa [#allocation5], 1 }
  0x43   :  { %129 = vsyncpa [#allocation6], 1 }

</bundles_post_ra>
